<compile_context>
chip_gen: v7x
topology: tpu7x:2x2x1
jax: 0.10.0
libtpu: 0.0.40
codegen_flags: <defaults>
</compile_context>

<pallas_src>
import jax
import jax.numpy as jnp
import numpy as np
from jax.experimental import pallas as pl
from jax.experimental.pallas import tpu as pltpu

MAX_ATOM_TYPE = 20
# irreps_node_embedding = '32x0e + 16x1e + 8x2e' (small test configuration)
IRREPS = ((32, 0), (16, 1), (8, 2))                 # (multiplicity, degree l)
C0 = sum(m for m, l in IRREPS if l == 0)            # scalar output channels = 32
D_TOTAL = sum(m * (2 * l + 1) for m, l in IRREPS)   # 32 + 48 + 40 = 120


def _node_embed_kernel(atom_ref, w_ref, b_ref, emb_ref, onehot_ref):
    # atom_ref   : (TN, 1)       int32
    # w_ref      : (A, D_TOTAL)  float32  (columns >= C0 are zero)
    # b_ref      : (1, D_TOTAL)  float32  (entries >= C0 are zero)
    # emb_ref    : (TN, D_TOTAL) out dtype
    # onehot_ref : (TN, A)       out dtype
    tn, a = onehot_ref.shape

    atom = atom_ref[...]                                       # (TN, 1)
    iota = jax.lax.broadcasted_iota(jnp.int32, (tn, a), 1)     # (TN, A)
    onehot = (atom == iota).astype(jnp.float32)                # (TN, A)
    onehot_ref[...] = onehot.astype(onehot_ref.dtype)

    # Single MXU matmul producing the full-width row (high-L columns of W are
    # zero, so the high-L block of the output is zero with no extra work).
    emb = jnp.dot(onehot, w_ref[...], preferred_element_type=jnp.float32) + b_ref[...]
    emb_ref[...] = emb.astype(emb_ref.dtype)


def _round_up(x, m):
    return ((int(x) + m - 1) // m) * m


def node_embedding_network(node_atom, weight, bias, *, tile_n=2048,
                           out_dtype=jnp.float32):
    """node_atom: (N,) int; weight: (A, C0); bias: (C0,) or (1, C0).

    Returns (node_embedding (N, D_TOTAL), node_attr (N, A), node_onehot (N, A)).
    node_attr IS node_onehot (same array), matching the PyTorch module.
    """
    n = int(node_atom.shape[0])

    # Pad the scalar-path weight/bias to full embedding width once (tiny).
    w_full = jnp.zeros((MAX_ATOM_TYPE, D_TOTAL), jnp.float32)
    w_full = w_full.at[:, :C0].set(weight.astype(jnp.float32))
    b_full = jnp.zeros((1, D_TOTAL), jnp.float32)
    b_full = b_full.at[:, :C0].set(bias.reshape(1, C0).astype(jnp.float32))

    # Tile size: large by default to amortize per-step overhead, but capped at
    # ~N/2 so the parallel grid axis has >=2 steps (both v7x TensorCores),
    # always a multiple of 8 (sublane constraint).  No padding of N: the edge
    # tile is masked by Pallas, so no post-kernel slice is needed.
    half = _round_up(pl.cdiv(n, 2), 8)
    tn = max(8, min(_round_up(tile_n, 8), half))
    grid = (pl.cdiv(n, tn),)

    atom2d = node_atom.astype(jnp.int32).reshape(n, 1)

    # VMEM budget: (tn,1) i32 atom tile is lane-padded to 128, emb tile pads
    # 120->128 lanes, onehot pads 20->128 lanes -> ~3 * tn * 512 B per buffer,
    # double-buffered.  Size the scoped VMEM limit accordingly (matters on
    # v5e's 16 MiB default when sweeping tile_n upward); keep headroom, cap
    # below v7x's 64 MiB physical VMEM.
    # TODO(synk): a (n//128,128) atom layout + in-kernel lane->sublane relayout
    # would shrink the atom tile ~128x and allow even larger tiles.
    per_step = 2 * 3 * tn * 128 * 4
    vmem_limit = int(min(max(per_step + (4 << 20), 32 << 20), 48 << 20))

    out_bytes = jnp.dtype(out_dtype).itemsize
    cost = pl.CostEstimate(
        flops=2 * n * MAX_ATOM_TYPE * D_TOTAL,
        transcendentals=0,
        bytes_accessed=n * (4 + (D_TOTAL + MAX_ATOM_TYPE) * out_bytes),
    )

    emb, onehot = pl.pallas_call(
        _node_embed_kernel,
        out_shape=(
            jax.ShapeDtypeStruct((n, D_TOTAL), out_dtype),
            jax.ShapeDtypeStruct((n, MAX_ATOM_TYPE), out_dtype),
        ),
        grid_spec=pltpu.PrefetchScalarGridSpec(
            num_scalar_prefetch=0,
            grid=grid,
            in_specs=[
                pl.BlockSpec((tn, 1), lambda i: (i, 0)),                   # node_atom
                pl.BlockSpec((MAX_ATOM_TYPE, D_TOTAL), lambda i: (0, 0)),  # W (resident)
                pl.BlockSpec((1, D_TOTAL), lambda i: (0, 0)),              # bias (resident)
            ],
            out_specs=[
                pl.BlockSpec((tn, D_TOTAL), lambda i: (i, 0)),             # node_embedding
                pl.BlockSpec((tn, MAX_ATOM_TYPE), lambda i: (i, 0)),       # onehot
            ],
        ),
        compiler_params=pltpu.CompilerParams(
            dimension_semantics=("parallel",),
            vmem_limit_bytes=vmem_limit,
        ),
        cost_estimate=cost,
    )(atom2d, w_full, b_full)

    # In the PyTorch module node_attr IS node_atom_onehot (same tensor).
    return emb, onehot, onehot


def _reference(node_atom, weight, bias):
    onehot = jax.nn.one_hot(node_atom, MAX_ATOM_TYPE, dtype=jnp.float32)
    scal = onehot @ weight + bias.reshape(1, C0)
    emb = jnp.concatenate(
        [scal, jnp.zeros((node_atom.shape[0], D_TOTAL - C0), jnp.float32)], axis=1
    )
    return emb, onehot, onehot


if __name__ == "__main__":
    key = jax.random.PRNGKey(0)
    k_w, k_b, k_a, k_a2, k_a3 = jax.random.split(key, 5)

    # Deterministic synthetic parameters (effective scalar-path weight + bias
    # of LinearRS(20x0e -> '32x0e+16x1e+8x2e') with the sqrt(A) rescale folded).
    weight = jax.random.normal(k_w, (MAX_ATOM_TYPE, C0), jnp.float32) / np.sqrt(
        MAX_ATOM_TYPE
    )
    bias = jax.random.normal(k_b, (C0,), jnp.float32) * 0.1

    # Case 1: small input (tile auto-shrinks to 8, grid of 2).
    N1 = 16
    atoms1 = jax.random.randint(k_a, (N1,), 0, MAX_ATOM_TYPE, dtype=jnp.int32)
    emb1, attr1, oh1 = node_embedding_network(atoms1, weight, bias)
    jax.block_until_ready((emb1, attr1, oh1))
    e_ref, _, oh_ref = _reference(atoms1, weight, bias)
    assert np.allclose(np.asarray(emb1), np.asarray(e_ref), atol=1e-5)
    assert np.allclose(np.asarray(oh1), np.asarray(oh_ref))
    assert emb1.shape == (N1, D_TOTAL) and oh1.shape == (N1, MAX_ATOM_TYPE)

    # Case 2: multi-tile grid with a masked (partial) edge tile, no padding.
    N2 = 2000
    atoms2 = jax.random.randint(k_a2, (N2,), 0, MAX_ATOM_TYPE, dtype=jnp.int32)
    emb2, attr2, oh2 = node_embedding_network(atoms2, weight, bias, tile_n=512)
    jax.block_until_ready((emb2, attr2, oh2))
    e_ref2, _, oh_ref2 = _reference(atoms2, weight, bias)
    assert np.allclose(np.asarray(emb2), np.asarray(e_ref2), atol=1e-5)
    assert np.allclose(np.asarray(oh2), np.asarray(oh_ref2))
    assert emb2.shape == (N2, D_TOTAL) and oh2.shape == (N2, MAX_ATOM_TYPE)

    # Case 3: N not a multiple of the sublane (8) and of the tile; default tile.
    N3 = 300
    atoms3 = jax.random.randint(k_a3, (N3,), 0, MAX_ATOM_TYPE, dtype=jnp.int32)
    emb3, attr3, oh3 = node_embedding_network(atoms3, weight, bias)
    jax.block_until_ready((emb3, attr3, oh3))
    e_ref3, _, oh_ref3 = _reference(atoms3, weight, bias)
    assert np.allclose(np.asarray(emb3), np.asarray(e_ref3), atol=1e-5)
    assert np.allclose(np.asarray(oh3), np.asarray(oh_ref3))
    assert emb3.shape == (N3, D_TOTAL) and oh3.shape == (N3, MAX_ATOM_TYPE)

    print("KERNEL_OK")
</pallas_src>

<mosaic_0001>
module attributes {stable_mosaic.version = 11 : i64} {
  func.func @_node_embed_kernel(%arg0: i32, %arg1: memref<8x1xi32, #tpu.memory_space<vmem>>, %arg2: memref<20x120xf32, #tpu.memory_space<vmem>>, %arg3: memref<1x120xf32, #tpu.memory_space<vmem>>, %arg4: memref<8x120xf32, #tpu.memory_space<vmem>>, %arg5: memref<8x20xf32, #tpu.memory_space<vmem>>) attributes {dimension_semantics = [#tpu.dimension_semantics<parallel>], iteration_bounds = array<i64: 2>, scalar_prefetch = 0 : i64, scratch_operands = 0 : i64, tpu.core_type = #tpu.core_type<tc>, window_params = [{transform_indices = @transform_0, window_bounds = array<i64: 8, 1>}, {pipeline_mode = #tpu.pipeline_mode<synchronous>, transform_indices = @transform_1, window_bounds = array<i64: 20, 120>}, {pipeline_mode = #tpu.pipeline_mode<synchronous>, transform_indices = @transform_2, window_bounds = array<i64: 1, 120>}, {transform_indices = @transform_3, window_bounds = array<i64: 8, 120>}, {transform_indices = @transform_4, window_bounds = array<i64: 8, 20>}]} {
    %c0 = arith.constant 0 : index
    %c0_0 = arith.constant 0 : index
    %0 = vector.load %arg1[%c0, %c0_0] : memref<8x1xi32, #tpu.memory_space<vmem>>, vector<8x1xi32>
    %1 = tpu.iota {dimensions = array<i32: 1>} : vector<8x20xi32>
    %2 = vector.broadcast %0 : vector<8x1xi32> to vector<8x20xi32>
    %3 = arith.cmpi eq, %2, %1 : vector<8x20xi32>
    %4 = arith.extui %3 : vector<8x20xi1> to vector<8x20xi32>
    %5 = arith.sitofp %4 : vector<8x20xi32> to vector<8x20xf32>
    %c0_1 = arith.constant 0 : index
    %c0_2 = arith.constant 0 : index
    %6 = vector.load %arg5[%c0_1, %c0_2] : memref<8x20xf32, #tpu.memory_space<vmem>>, vector<8x20xf32>
    tpu.vector_store %arg5[%c0_1, %c0_2], %5 {strides = array<i32>} : memref<8x20xf32, #tpu.memory_space<vmem>>, vector<8x20xf32>,
    %c0_3 = arith.constant 0 : index
    %c0_4 = arith.constant 0 : index
    %7 = vector.load %arg2[%c0_3, %c0_4] : memref<20x120xf32, #tpu.memory_space<vmem>>, vector<20x120xf32>
    %cst = arith.constant dense<0.000000e+00> : vector<8x120xf32>
    %8 = tpu.matmul %5, %7, %cst {dimension_numbers = #tpu.dot_dimension_numbers<[1], [0], [0], [1], [0, 0, 1, 1], [], []>} : vector<8x20xf32>, vector<20x120xf32>, vector<8x120xf32> -> vector<8x120xf32>
    %c0_5 = arith.constant 0 : index
    %c0_6 = arith.constant 0 : index
    %9 = vector.load %arg3[%c0_5, %c0_6] : memref<1x120xf32, #tpu.memory_space<vmem>>, vector<1x120xf32>
    %10 = vector.broadcast %9 : vector<1x120xf32> to vector<8x120xf32>
    %11 = arith.addf %8, %10 : vector<8x120xf32>
    %c0_7 = arith.constant 0 : index
    %c0_8 = arith.constant 0 : index
    %12 = vector.load %arg4[%c0_7, %c0_8] : memref<8x120xf32, #tpu.memory_space<vmem>>, vector<8x120xf32>
    tpu.vector_store %arg4[%c0_7, %c0_8], %11 {strides = array<i32>} : memref<8x120xf32, #tpu.memory_space<vmem>>, vector<8x120xf32>,
    return
  }
  func.func @transform_0(%arg0: i32) -> (i32, i32) {
    %c0_i32 = arith.constant 0 : i32
    %c0_i32_0 = arith.constant 0 : i32
    return %arg0, %c0_i32 : i32, i32
  }
  func.func @transform_1(%arg0: i32) -> (i32, i32) {
    %c0_i32 = arith.constant 0 : i32
    %c0_i32_0 = arith.constant 0 : i32
    %c0_i32_1 = arith.constant 0 : i32
    return %c0_i32, %c0_i32_0 : i32, i32
  }
  func.func @transform_2(%arg0: i32) -> (i32, i32) {
    %c0_i32 = arith.constant 0 : i32
    %c0_i32_0 = arith.constant 0 : i32
    %c0_i32_1 = arith.constant 0 : i32
    return %c0_i32, %c0_i32_0 : i32, i32
  }
  func.func @transform_3(%arg0: i32) -> (i32, i32) {
    %c0_i32 = arith.constant 0 : i32
    %c0_i32_0 = arith.constant 0 : i32
    return %arg0, %c0_i32 : i32, i32
  }
  func.func @transform_4(%arg0: i32) -> (i32, i32) {
    %c0_i32 = arith.constant 0 : i32
    %c0_i32_0 = arith.constant 0 : i32
    return %arg0, %c0_i32 : i32, i32
  }
}

</mosaic_0001>

<bundles_post_ra>
// kernel: tpu_custom_call.1
= control target key start
LH: loop header
LB: loop body
LE: loop exit
PB: predicated region body
PF: predicated region fallthrough
CT: control target
= control target key end

     0   :  { %10 = vsyncpa [#allocation3], 0  ;;  %s886_s0 = inlined_call_operand.vmem [shape: s32[16,1], index: 0, kind: input, shape index: {}]   ;;  %s887_s1 = inlined_call_operand.hbm [shape: f32[20,120], index: 1, kind: input, shape index: {}]   ;;  %s888_s2 = inlined_call_operand.vmem [shape: f32[1,120], index: 2, kind: input, shape index: {}]   ;;  %s889_s3 = inlined_call_operand.hbm [shape: f32[16,120], index: 3, kind: output, shape index: {0}]   ;;  %s890_s4 = inlined_call_operand.hbm [shape: f32[16,20], index: 4, kind: output, shape index: {1}]  }
   0x1   :  { %11 = vsyncpa [#allocation4], 0 }
   0x2   :  { %13 = vsyncpa [#allocation4 + $0x1], 0 }
   0x3   :  { %14 = vsyncpa [#allocation7], 0 }
   0x4   :  { %16 = vsyncpa [#allocation7 + $0x1], 0  ;;  %s713_s15 = smov 0   ;;  %s715_s16 = smov 0  }
   0x5   :  { %s717_s17 = smov 0   ;;  %s719_s18 = smov 0  }
   0x6 LB: > { %s734_s19 = sadd.s32 4294967295, %s677_s18   ;;  %s454_s20 = sadd.s32 4294967294, %s677_s18   ;;  %s677_s18 = sphi %s719_s18, %s906_s18   ;;  %s673_s17 = sphi %s717_s17, %s905_s17   ;;  %s669_s16 = sphi %s715_s16, %s904_s16   ;;  %s665_s15 = sphi %s713_s15, %s903_s15  }
   0x7   : > { %s738_s21 = sadd.s32 1, %s677_s18   ;;  %s97_s22 = sadd.s32 1, %s673_s17 }
   0x8   : > { %s94_s23 = ssub.s32 %s677_s18, %s738_s21  ;;  %p107_p0 = scmp.ne.s32.totalorder %s673_s17, %s669_s16 }
   0x9   : > { %p95_p1 = scmp.eq.s32.totalorder %s94_s23, 0  ;;  %p108_p2 = scmp.eq.s32.totalorder %s734_s19, 1 }
   0xa   : > { %p113_p3 = scmp.ne.s32.totalorder %s669_s16, %s665_s15  ;;  %p114_p4 = scmp.eq.s32.totalorder %s454_s20, 1 }
   0xb   : > { %s749_s24 = scalar_select %p95_p1, %s673_s17, %s97_s22  }
   0xc   : > { %p751_p5 = por %p108_p2, %p107_p0  ;;  %p755_p6 = por %p114_p4, %p113_p3 }
   0xd   : > { %p455_p7 = scmp.ge.s32.totalorder %s677_s18, 1  ;;  %p147_p8 = scmp.lt.s32.totalorder %s677_s18, 3 }
   0xe   : > { %s894_s25 = scalar_select %p751_p5, 1, 0 }
   0xf   : > { %s895_s26 = scalar_select %p755_p6, 1, 0 }
  0x10   : > { %p891_p9 = scmp.eq.s32.totalorder %s734_s19, 0  ;;  %p762_p10 = pnand %p455_p7, %p147_p8 }
  0x11   : > { %s679_s28 = smov [#allocation2]   ;;  %s551_s7 = scalar_lea.hbm %s887_s1, 384 }
  0x12   : > { %s896_s27 = scalar_select %p762_p10, 1, 0 }
  0x13   : > { %s159_s29 = sshll.u32 %s679_s28, 4  ;;  %p497_p11 = pneg %p762_p10  ;;  %s160_s29 = int_to_ptr.vmem [resolvable:$true] %s159_s29 }
  0x14   : > { %p552_p13 = scmp.ne.s32.totalorder %s887_s1, %s551_s7  ;;  %p558_p3 = scmp.lt.u32.totalorder %s551_s7, %s887_s1 }
  0x15   : > { %p770_p12 = pnand %p891_p9, %p497_p11 }
  0x17   : > { %p553_p0 = pneg %p770_p12 }
  0x19   : > { %p554_p1 = pnand %p553_p0, %p552_p13 }
  0x1b   : > { %p555_p2 = pneg %p554_p1 }
  0x1d   : > { %p560_p4 = pnand %p558_p3, %p555_p2 }
  0x1f   : > { %563 = shalt.err (!%p560_p4)
}
  0x20   : > { %s564_s12 = scalar_lea.vmem %s160_s29, 384  ;;  %p572_p9 = scmp.lt.s32.totalorder %s160_s29, %s160_s29 }
  0x21   : > { %p565_p7 = scmp.ne.s32.totalorder %s160_s29, %s564_s12  ;;  %p573_p6 = scmp.lt.s32.totalorder %s564_s12, %s564_s12 }
  0x23   : > { %p567_p8 = pnand %p565_p7, %p553_p0  ;;  %p574_p5 = por %p573_p6, %p572_p9 }
  0x25   : > { %p568_p11 = pneg %p567_p8 }
  0x27   : > { %p575_p10 = pnand %p574_p5, %p568_p11 }
  0x29   : > { %578 = shalt.err (!%p575_p10)
}
  0x2a   : > { %s680_s13 = smov 128   ;;  %s681_s14 = smov 8  }
  0x2b   : > { %500 = dma.hbm_to_vmem [thread:$0]  (!%p770_p12), %s887_s1, 384, %s160_s29, [#allocation3], %s680_s13, %s680_s13, %s681_s14  }
  0x2c   : > { %p898_p13 = scmp.ne.s32.totalorder %s896_s27, 0 }
  0x2d   : > { %p899_p1 = scmp.eq.s32.totalorder (!%p898_p13), %s734_s19, 0 }
  0x2e   : > { %185 = sbr.rel (%p898_p13) target bundleno = 419 (0x1a3), region = 32 }
  0x35   : > { %652 = dma.done.wait (%p899_p1), [#allocation3], 384   ;;  %p900_p0 = pmov %p899_p1 }
  0x36   : > { %p215_p5 = scmp.lt.s32.totalorder %s734_s19, 1  ;;  %v682_v0 = vmov 0   ;;  %v683_v1 = vmov 0.0|0.0   ;;  %v230_v3 = vld [vmem:[#allocation2] sm:$0xff]  ;;  %v231_v4 = vld [vmem:[#allocation2 + $0x8] sm:$0xff]  ;;  %vm684_vm0 = vmmov 0   ;;  %v220_v8 = vlaneseq }
  0x37   : > { %654 = vsyncadd (%p900_p0), [#allocation3], 4294966912  ;;  %550 = vset.pattern.permute.xlu0 %v682_v0  ;;  %486 = vmatprep.subr.bf16.mxu0 %v683_v1  ;;  %v487_v5 = vpack.c.bf16 %v231_v4, %v230_v3  ;;  %v685_v6 = vmov 0.0   ;;  %v232_v7 = vld [vmem:[#allocation2 + $0x10] sm:$0xf]  ;;  %vm243_vm1 = vcmask 1043456  }
  0x38   : > { %s216_s23 = scalar_select %p215_p5, %s734_s19, 1  ;;  %483 = vmatprep.mubr.msk.f32.mxu0 %vm684_vm0, %v685_v6  ;;  %v221_v9 = vand.u32 127, %v220_v8  ;;  %vm228_vm2 = vcmask 162816  }
  0x39   : > { %488 = vmatpush3.bf16.msra.mxu0 %v487_v5  ;;  %s802_s5 = sand.u32 1, %s669_s16   ;;  %s469_s8 = sshll.u32 %s734_s19, 7 }
  0x3a   : > { %s462_s28 = sshll.u32 %s216_s23, 3  ;;  %481 = vmatprep.subr.mxu0 %v685_v6  ;;  %s460_s6 = sshll.u32 %s802_s5, 3 }
  0x3b   : > { %s218_s27 = scalar_lea.vmem %s886_s0, %s462_s28  ;;  %s214_s7 = scalar_lea.vmem [#allocation6], %s460_s6 }
  0x3c   : > { %v219_v2 = vld [vmem:[%s218_s27] sm:$0xff]  ;;  %s813_s11 = scalar_lea.hbm %s890_s4, %s469_s8  ;;  %s351_s12 = sshll.u32 %s214_s7, 4  ;;  %s352_s12 = int_to_ptr.vmem [resolvable:$true] %s351_s12 }
  0x3d   : > { %223 = vperm.xlu0 %550, %v219_v2   ;;  %482 = vmatpush3.msk.msra.mxu0 %vm243_vm1, %v232_v7  ;;  %s325_s13 = scalar_lea.sflag [#allocation7], %s802_s5  ;;  %s579_s14 = scalar_lea.vmem %s352_s12, 128 }
  0x3e   : > { %p580_p6 = scmp.ne.s32.totalorder %s352_s12, %s579_s14  ;;  %p901_p9 = scmp.ne.s32.totalorder %s894_s25, 0 }
  0x3f   : > { %s686_s20 = smov [#allocation6]  }
  0x40   : > { %p581_p10 = pnand %p580_p6, %p901_p9  ;;  %s583_s22 = sshll.u32 %s686_s20, 4  ;;  %s584_s22 = int_to_ptr.vmem [resolvable:$false] %s583_s22 }
  0x41   : > { %s585_s23 = scalar_lea.vmem %s584_s22, 256  ;;  %p586_p2 = scmp.lt.s32.totalorder %s352_s12, %s584_s22 }
  0x42   : > { %p582_p12 = pneg %p581_p10  ;;  %p587_p3 = scmp.lt.s32.totalorder %s585_s23, %s579_s14 }
  0x44   : > { %p588_p4 = por %p587_p3, %p586_p2 }
  0x46   : > { %p589_p7 = pnand %p588_p4, %p582_p12 }
  0xbc   : > { %v224_v10 = vpop.permute.xlu0 %223 }
  0xbd   : > { %vm225_vm3 = vcmp.eq.s32.totalorder %v224_v10, %v221_v9 }
  0xbe   : > { %v463_v11 = vsel %vm225_vm3, 1.0, %v685_v6 }
  0xbf   : > { %484 = vmatmul.mubr.msk.f32.vlgmr.msra.gmra.mrb[0].mxu0 %vm228_vm2, %v463_v11  ;;  %229 = vst.msk [vmem:[%s214_s7] sm:$0xff] %vm228_vm2, %v463_v11 }
  0xc0   : > { %592 = shalt.err (!%p589_p7)
}
  0xc1   : > { %s593_s28 = scalar_lea.hbm %s813_s11, 128  ;;  %s597_s27 = scalar_lea.hbm %s890_s4, 256 }
  0xc2   : > { %p594_p8 = scmp.ne.s32.totalorder %s813_s11, %s593_s28  ;;  %p598_p1 = scmp.lt.u32.totalorder %s813_s11, %s890_s4 }
  0xc3   : > { %p599_p0 = scmp.lt.u32.totalorder %s597_s27, %s593_s28  ;;  %p601_p6 = scmp.lt.u32.totalorder %s593_s28, %s813_s11 }
  0xc4   : > { %p595_p11 = pnand %p594_p8, %p901_p9 }
  0xc5   : > { %p600_p5 = por %p599_p0, %p598_p1 }
  0xc6   : > { %p596_p13 = pneg %p595_p11 }
  0xc7   : > { %p602_p10 = por %p601_p6, %p600_p5 }
  0xc9   : > { %p603_p12 = pnand %p602_p10, %p596_p13 }
  0xcb   : > { %606 = shalt.err (!%p603_p12)
}
  0xcc   : > { %494 = dma.vmem_to_hbm [thread:$0]  (%p901_p9), %s352_s12, 128, %s813_s11, %s325_s13   ;;  %v464_v12 = vld [vmem:[%s888_s2] ss:$0 sm:$0xff]  ;;  %vm317_vm4 = vcmask 982016  }
  0xcd   : > { %s207_s20 = scalar_lea.vmem [#allocation5], %s460_s6  ;;  %s843_s30 = scalar_lea.hbm %s889_s3, %s469_s8 }
  0xce   : > { %s338_s22 = sshll.u32 %s207_s20, 4  ;;  %s320_s11 = scalar_lea.sflag [#allocation4], %s802_s5  ;;  %s845_s22 = int_to_ptr.vmem [resolvable:$true] %s338_s22 }
  0xcf   : > { %s607_s12 = scalar_lea.vmem %s845_s22, 128  ;;  %s687_s6 = smov [#allocation5]  }
  0xd0   : > { %p608_p2 = scmp.ne.s32.totalorder %s845_s22, %s607_s12  ;;  %s611_s13 = sshll.u32 %s687_s6, 4  ;;  %s612_s13 = int_to_ptr.vmem [resolvable:$false] %s611_s13 }
  0xd1   : > { %s613_s19 = scalar_lea.vmem %s612_s13, 256  ;;  %p614_p7 = scmp.lt.s32.totalorder %s845_s22, %s612_s13 }
  0xd2   : > { %p609_p3 = pnand %p608_p2, %p901_p9  ;;  %p615_p8 = scmp.lt.s32.totalorder %s613_s19, %s607_s12 }
  0xd4   : > { %p610_p4 = pneg %p609_p3  ;;  %p616_p11 = por %p615_p8, %p614_p7 }
  0xd6   : > { %p617_p13 = pnand %p616_p11, %p610_p4 }
 0x192   : > { %v313_v13 = vpop.f32.mrb[0].mxu0 }
 0x193   : > { %v314_v14 = vadd.f32 %v464_v12, %v313_v13  ;;  %v485_v15 = vpop.f32.mrb[1].mxu0 }
 0x195   : > { %318 = vst.msk [vmem:[%s207_s20] sm:$0xff] %vm317_vm4, %v314_v14 }
 0x196   : > { %620 = shalt.err (!%p617_p13)
}
 0x197   : > { %s621_s5 = scalar_lea.hbm %s843_s30, 128  ;;  %s625_s27 = scalar_lea.hbm %s889_s3, 256 }
 0x198   : > { %p622_p1 = scmp.ne.s32.totalorder %s843_s30, %s621_s5  ;;  %p626_p6 = scmp.lt.u32.totalorder %s843_s30, %s889_s3 }
 0x199   : > { %p627_p10 = scmp.lt.u32.totalorder %s625_s27, %s621_s5  ;;  %p629_p2 = scmp.lt.u32.totalorder %s621_s5, %s843_s30 }
 0x19a   : > { %p623_p0 = pnand %p622_p1, %p901_p9 }
 0x19b   : > { %p628_p12 = por %p627_p10, %p626_p6 }
 0x19c   : > { %p624_p5 = pneg %p623_p0 }
 0x19d   : > { %p630_p3 = por %p629_p2, %p628_p12 }
 0x19f   : > { %p631_p4 = pnand %p630_p3, %p624_p5 }
 0x1a1   : > { %634 = shalt.err (!%p631_p4)
}
 0x1a2   : > { %493 = dma.vmem_to_hbm [thread:$0]  (%p901_p9), %s845_s22, 128, %s843_s30, %s320_s11  }
 0x1a3 PF: > { %p510_p7 = scmp.ge.s32.totalorder %s677_s18, 2  ;;  %s363_s10 = sand.u32 1, %s665_s15  }
 0x1a4   : > { %p902_p8 = scmp.ne.s32.totalorder %s895_s26, 0  ;;  %s364_s14 = scalar_lea.sflag [#allocation4], %s363_s10 }
 0x1a6   : > { %p502_p11 = pnand %p510_p7, %p902_p8 }
 0x1a8   : > { %656 = dma.done.wait (!%p502_p11), %s364_s14, 128  }
 0x1a9   : > { %658 = vsyncadd (!%p502_p11), %s364_s14, 4294967168  ;;  %s373_s20 = scalar_lea.sflag [#allocation7], %s363_s10 }
 0x1aa   : > { %660 = dma.done.wait (!%p502_p11), %s373_s20, 128  }
 0x1ab   : > { %662 = vsyncadd (!%p502_p11), %s373_s20, 4294967168  ;;  %p19_p9 = scmp.ge.s32.totalorder %s738_s21, 4   ;;  %s903_s15 = smov %s669_s16 }
 0x1ac   : > { %s904_s16 = smov %s673_s17  ;;  %s905_s17 = smov %s749_s24 }
 0x1ad   : > { %s906_s18 = smov %s738_s21  ;;  %21 = sbr.rel (!%p19_p9) target bundleno = 6 (0x6), region = 89 }
 0x1b4   :  { %378 = vsyncpa [#allocation3], 1 }
 0x1b5   :  { %380 = vsyncpa [#allocation3 + $0x1], 1 }
 0x1b6   :  { %381 = vsyncpa [#allocation4], 1 }
 0x1b7   :  { %383 = vsyncpa [#allocation4 + $0x1], 1 }
 0x1b8   :  { %384 = vsyncpa [#allocation7], 1 }
 0x1b9   :  { %386 = vsyncpa [#allocation7 + $0x1], 1 }

</bundles_post_ra>
